<compile_context>
chip_gen: v7x
topology: tpu7x:2x2x1
jax: 0.10.0
libtpu: 0.0.40
codegen_flags: <defaults>
</compile_context>

<pallas_src>
import jax
import jax.numpy as jnp
from jax.experimental import pallas as pl
from jax.experimental.pallas import tpu as pltpu

_LANE_CHOICES = (1024, 512, 256, 128)   # lane-dense last dims (multiples of 128)
_MAX_BLOCK_ELEMS = 512 * 1024           # 2 MiB per f32 block


def _make_tri_kernel(a, c, inv_ba, inv_cb, d):
    # a, c, inv_ba, inv_cb, d are Python floats baked in at trace time.
    def kernel(x_ref, o_ref):
        x = x_ref[...]
        rising = (x - a) * inv_ba       # == (x - a) / (b - a)
        falling = (c - x) * inv_cb      # == (c - x) / (c - b)
        tri = jnp.maximum(jnp.minimum(rising, falling), 0.0)
        if d != 1.0:
            tri = d * tri
        o_ref[...] = tri.astype(o_ref.dtype)
    return kernel


def triangle_mf(x, a=-1.0, b=0.0, c=1.0, d=1.0):
    """TriangleMF forward pass (pure elementwise) for an arbitrary-shaped tensor."""
    a, b, c = sorted((float(a), float(b), float(c)))
    d = float(d)
    # NOTE: degenerate triangles (b == a or c == b) divide by zero exactly like
    # the PyTorch module does (inf/nan); precondition is a < b < c.
    inv_ba = 1.0 / (b - a)
    inv_cb = 1.0 / (c - b)
    kernel = _make_tri_kernel(a, c, inv_ba, inv_cb, d)

    orig_shape = x.shape
    total = x.size
    if total == 0:
        return x

    x_flat = jnp.ravel(x)

    # Fast path: pick the largest lane width that divides the element count ->
    # free contiguous reshape, zero padding copies.
    lane = next((l for l in _LANE_CHOICES if total % l == 0), None)
    padded_total = total
    if lane is None:
        # Rare fallback: pad to a multiple of 128 (costs one extra copy).
        lane = 128
        padded_total = pl.cdiv(total, lane) * lane
        x_flat = jnp.pad(x_flat, (0, padded_total - total))
    rows = padded_total // lane
    x2d = x_flat.reshape(rows, lane)

    max_tm = max(8, _MAX_BLOCK_ELEMS // lane)   # ~2 MiB f32 tile, sublane-aligned
    if rows <= max_tm:
        # Single block equal to the full array dims (always a legal block shape).
        tm = rows
        grid = (1,)
    else:
        # (tm % 8 == 0, lane % 128 == 0): legal block; ragged last tile is fine
        # for a pure elementwise op (out-of-range writes are dropped).
        tm = max_tm
        grid = (pl.cdiv(rows, tm),)

    out2d = pl.pallas_call(
        kernel,
        out_shape=jax.ShapeDtypeStruct(x2d.shape, x2d.dtype),
        grid=grid,
        in_specs=[pl.BlockSpec((tm, lane), lambda i: (i, 0))],
        out_specs=pl.BlockSpec((tm, lane), lambda i: (i, 0)),
        compiler_params=pltpu.CompilerParams(
            dimension_semantics=("parallel",)),
    )(x2d)

    out_flat = out2d.reshape(-1)
    if padded_total != total:
        out_flat = out_flat[:total]
    return out_flat.reshape(orig_shape)


def _triangle_mf_ref(x, a=-1.0, b=0.0, c=1.0, d=1.0):
    a, b, c = sorted((float(a), float(b), float(c)))
    rising = (x - a) / (b - a)
    falling = (c - x) / (c - b)
    return d * jnp.maximum(jnp.minimum(rising, falling), 0.0)


if __name__ == "__main__":
    key = jax.random.PRNGKey(0)

    # primary test: small NCHW input consistent with a conv-style module
    x = jax.random.normal(key, (2, 4, 16, 16), dtype=jnp.float32) * 2.0
    out = jax.block_until_ready(triangle_mf(x, a=-1.0, b=0.0, c=1.0, d=1.0))
    ref = _triangle_mf_ref(x, a=-1.0, b=0.0, c=1.0, d=1.0)
    assert out.shape == x.shape
    assert jnp.allclose(out, ref, atol=1e-6, rtol=1e-6)

    # secondary checks: non-128-divisible fallback path and custom params
    k1, k2 = jax.random.split(key)
    x_odd = jax.random.normal(k1, (3, 5, 7), dtype=jnp.float32) * 3.0
    out_odd = jax.block_until_ready(triangle_mf(x_odd, a=-0.5, b=0.25, c=2.0, d=1.5))
    ref_odd = _triangle_mf_ref(x_odd, a=-0.5, b=0.25, c=2.0, d=1.5)
    assert jnp.allclose(out_odd, ref_odd, atol=1e-6, rtol=1e-6)

    # multi-block / ragged-tail path (rows = 514 > 512 -> grid of 2, partial tile)
    x_big = jax.random.normal(k2, (2, 257, 1024), dtype=jnp.float32)
    out_big = jax.block_until_ready(triangle_mf(x_big))
    ref_big = _triangle_mf_ref(x_big)
    assert jnp.allclose(out_big, ref_big, atol=1e-6, rtol=1e-6)

    print("KERNEL_OK")
</pallas_src>

<mosaic_0001>
module attributes {stable_mosaic.version = 11 : i64} {
  func.func @kernel(%arg0: i32, %arg1: memref<2x1024xf32, #tpu.memory_space<vmem>>, %arg2: memref<2x1024xf32, #tpu.memory_space<vmem>>) attributes {dimension_semantics = [#tpu.dimension_semantics<parallel>], iteration_bounds = array<i64: 1>, scalar_prefetch = 0 : i64, scratch_operands = 0 : i64, tpu.core_type = #tpu.core_type<tc>, window_params = [{transform_indices = @transform_0, window_bounds = array<i64: 2, 1024>}, {transform_indices = @transform_1, window_bounds = array<i64: 2, 1024>}]} {
    %c0 = arith.constant 0 : index
    %c0_0 = arith.constant 0 : index
    %0 = vector.load %arg1[%c0, %c0_0] : memref<2x1024xf32, #tpu.memory_space<vmem>>, vector<2x1024xf32>
    %cst = arith.constant -1.000000e+00 : f32
    %1 = vector.broadcast %cst : f32 to vector<2x1024xf32>
    %2 = arith.subf %0, %1 : vector<2x1024xf32>
    %cst_1 = arith.constant 1.000000e+00 : f32
    %3 = vector.broadcast %cst_1 : f32 to vector<2x1024xf32>
    %4 = arith.mulf %2, %3 : vector<2x1024xf32>
    %cst_2 = arith.constant 1.000000e+00 : f32
    %5 = vector.broadcast %cst_2 : f32 to vector<2x1024xf32>
    %6 = arith.subf %5, %0 : vector<2x1024xf32>
    %cst_3 = arith.constant 1.000000e+00 : f32
    %7 = vector.broadcast %cst_3 : f32 to vector<2x1024xf32>
    %8 = arith.mulf %6, %7 : vector<2x1024xf32>
    %9 = arith.minimumf %4, %8 : vector<2x1024xf32>
    %cst_4 = arith.constant 0.000000e+00 : f32
    %10 = vector.broadcast %cst_4 : f32 to vector<2x1024xf32>
    %11 = arith.maximumf %9, %10 : vector<2x1024xf32>
    %c0_5 = arith.constant 0 : index
    %c0_6 = arith.constant 0 : index
    %12 = vector.load %arg2[%c0_5, %c0_6] : memref<2x1024xf32, #tpu.memory_space<vmem>>, vector<2x1024xf32>
    tpu.vector_store %arg2[%c0_5, %c0_6], %11 {strides = array<i32>} : memref<2x1024xf32, #tpu.memory_space<vmem>>, vector<2x1024xf32>,
    return
  }
  func.func @transform_0(%arg0: i32) -> (i32, i32) {
    %c0_i32 = arith.constant 0 : i32
    %c0_i32_0 = arith.constant 0 : i32
    return %arg0, %c0_i32 : i32, i32
  }
  func.func @transform_1(%arg0: i32) -> (i32, i32) {
    %c0_i32 = arith.constant 0 : i32
    %c0_i32_0 = arith.constant 0 : i32
    return %arg0, %c0_i32 : i32, i32
  }
}

</mosaic_0001>

<bundles_post_ra>
// kernel: tpu_custom_call.1
= control target key start
LH: loop header
LB: loop body
LE: loop exit
PB: predicated region body
PF: predicated region fallthrough
CT: control target
= control target key end

     0   :  { %6 = vsyncpa [#allocation3], 0  ;;  %s136_s0 = inlined_call_operand.hbm [shape: f32[2,1024], index: 0, kind: input, shape index: {}]   ;;  %s137_s1 = inlined_call_operand.hbm [shape: f32[2,1024], index: 1, kind: output, shape index: {}]  }
   0x1   :  { %7 = vsyncpa [#allocation4], 0  ;;  %s100_s6 = smov [#allocation2]   ;;  %s52_s10 = scalar_lea.hbm %s136_s0, 256 }
   0x2   :  { %s14_s7 = sshll.u32 %s100_s6, 4  ;;  %p53_p0 = scmp.ne.s32.totalorder %s136_s0, %s52_s10  ;;  %s15_s7 = int_to_ptr.vmem [resolvable:$true] %s14_s7 }
   0x3   :  { %p56_p1 = scmp.lt.u32.totalorder %s52_s10, %s136_s0 }
   0x5   :  { %p58_p2 = pnand %p56_p1, %p53_p0 }
   0x7   :  { %61 = shalt.err (!%p58_p2)
}
   0x8   :  { %s62_s15 = scalar_lea.vmem %s15_s7, 256  ;;  %p67_p4 = scmp.lt.s32.totalorder %s15_s7, %s15_s7 }
   0x9   :  { %p63_p3 = scmp.ne.s32.totalorder %s15_s7, %s62_s15  ;;  %p68_p5 = scmp.lt.s32.totalorder %s62_s15, %s62_s15 }
   0xb   :  { %p69_p6 = por %p68_p5, %p67_p4 }
   0xd   :  { %p70_p7 = pnand %p69_p6, %p63_p3 }
   0xf   :  { %73 = shalt.err (!%p70_p7)
}
  0x10   :  { %17 = dma.hbm_to_vmem [thread:$0]  %s136_s0, 256, %s15_s7, [#allocation3]  }
  0x11   :  { %96 = dma.done.wait [#allocation3], 256  }
  0x12   :  { %97 = vsyncadd [#allocation3], 4294967040  ;;  %v21_v0 = vld [vmem:[#allocation2] sm:$0xff]  ;;  %v22_v1 = vld [vmem:[#allocation2 + $0x8] sm:$0xff]  ;;  %s101_s18 = smov [#allocation5]  }
  0x13   :  { %v48_v2 = vadd.f32 1.0, %v21_v0  ;;  %v25_v3 = vsub.f32 1.0, %v21_v0  ;;  %v49_v4 = vadd.f32 1.0, %v22_v1  ;;  %v26_v5 = vsub.f32 1.0, %v22_v1  ;;  %s39_s19 = sshll.u32 %s101_s18, 4  ;;  %s40_s19 = int_to_ptr.vmem [resolvable:$true] %s39_s19 }
  0x14   :  { %s74_s20 = scalar_lea.vmem %s40_s19, 256  ;;  %p79_p9 = scmp.lt.s32.totalorder %s40_s19, %s40_s19 }
  0x15   :  { %v27_v6 = vmin.f32 %v48_v2, %v25_v3  ;;  %v28_v7 = vmin.f32 %v49_v4, %v26_v5  ;;  %p75_p8 = scmp.ne.s32.totalorder %s40_s19, %s74_s20  ;;  %p80_p10 = scmp.lt.s32.totalorder %s74_s20, %s74_s20 }
  0x17   :  { %v29_v8 = vmax.f32 %v27_v6, 0.0  ;;  %v30_v9 = vmax.f32 %v28_v7, 0.0  ;;  %p81_p11 = por %p80_p10, %p79_p9 }
  0x19   :  { %31 = vst [vmem:[#allocation5] sm:$0xff] %v29_v8  ;;  %32 = vst [vmem:[#allocation5 + $0x8] sm:$0xff] %v30_v9  ;;  %p82_p12 = pnand %p81_p11, %p75_p8 }
  0x1b   :  { %85 = shalt.err (!%p82_p12)
}
  0x1c   :  { %s86_s22 = scalar_lea.hbm %s137_s1, 256 }
  0x1d   :  { %p87_p13 = scmp.ne.s32.totalorder %s137_s1, %s86_s22  ;;  %p90_p0 = scmp.lt.u32.totalorder %s86_s22, %s137_s1 }
  0x1f   :  { %p92_p1 = pnand %p90_p0, %p87_p13 }
  0x21   :  { %95 = shalt.err (!%p92_p1)
}
  0x22   :  { %42 = dma.vmem_to_hbm [thread:$0]  %s40_s19, 256, %s137_s1, [#allocation4]  }
  0x23   :  { %98 = dma.done.wait [#allocation4], 256  }
  0x24   :  { %99 = vsyncadd [#allocation4], 4294967040 }
  0x25   :  { %46 = vsyncpa [#allocation3], 1 }
  0x26   :  { %47 = vsyncpa [#allocation4], 1 }

</bundles_post_ra>
